<compile_context>
chip_gen: v7x
topology: tpu7x:2x2x1
jax: 0.10.0
libtpu: 0.0.40
codegen_flags: <defaults>
</compile_context>

<pallas_src>
import functools

import jax
import jax.numpy as jnp
from jax.experimental import pallas as pl
from jax.experimental.pallas import tpu as pltpu

_LANE = 128
_MIB = 1024 * 1024
# Target bytes for one block including double-buffered I/O and f32 temps.
_TILE_BUDGET = 12 * _MIB


def _bn2d_kernel(x_ref, gamma_ref, beta_ref, o_ref, *, eps, num_features):
    """Channel-dim batch norm on one block.

    Works for both block layouts (channel reduction is axis=1 in either case):
      4D fast path  : x_ref (NB, C, TS, 128), gamma/beta (1, C, 1, 128)
      3D ragged path: x_ref (NB, C, T),       gamma/beta (1, C, 1)
    """
    C = num_features
    x = x_ref[...].astype(jnp.float32)

    mean = jnp.sum(x, axis=1, keepdims=True) * jnp.float32(1.0 / C)
    diff = x - mean
    # Unbiased variance (torch.var default, correction=1).  C == 1 divides by
    # zero -> inf/nan at runtime, matching PyTorch's unbiased var behavior.
    var = jnp.sum(diff * diff, axis=1, keepdims=True) / jnp.float32(C - 1)
    inv_std = jax.lax.rsqrt(var + jnp.float32(eps))

    gamma = gamma_ref[...]  # already float32
    beta = beta_ref[...]
    o_ref[...] = (diff * inv_std * gamma + beta).astype(o_ref.dtype)


def _round_up(v, m):
    return ((v + m - 1) // m) * m


def _largest_divisor_leq(n, cap):
    cap = max(1, min(n, cap))
    for d in range(cap, 0, -1):
        if n % d == 0:
            return d
    return 1


def _vmem_ceiling_bytes():
    """Per-generation safe ceiling for vmem_limit_bytes."""
    try:
        cap = int(pltpu.get_tpu_info().vmem_capacity_bytes)
    except Exception:
        cap = 64 * _MIB
    if cap <= 0:
        cap = 64 * _MIB
    # Leave >= 24 MiB headroom for compiler scratch; cap at 48 MiB (v5e/v6e,
    # 128 MiB physical) which becomes 40 MiB on v7x (64 MiB physical per TC).
    return max(24 * _MIB, min(cap - 24 * _MIB, 48 * _MIB))


def batch_norm_2d(x, gamma, beta, eps=1e-5):
    """x: (N, C, H, W); gamma, beta: (C,).  Normalizes over the channel dim.

    Note: C == 1 yields inf/nan (unbiased variance divides by C-1 == 0),
    identical to the PyTorch reference.
    """
    N, C, H, W = x.shape
    HW = H * W
    itemsize = jnp.dtype(x.dtype).itemsize
    # Packed sublane multiple: 8 for 4-byte, 16 for 2-byte, 32 for 1-byte dtypes.
    sub = max(8, 32 // itemsize)
    # Bytes per block element, everything live at once:
    #   2 pipelined input + 2 pipelined output buffers (x.dtype each)
    #   + ~2 full-block f32 temporaries inside the body (x upcast, diff).
    bytes_per_elem = 4 * itemsize + 8

    gamma_f32 = gamma.astype(jnp.float32)
    beta_f32 = beta.astype(jnp.float32)

    kernel = functools.partial(_bn2d_kernel, eps=eps, num_features=C)
    vmem_ceiling = _vmem_ceiling_bytes()

    # TODO(synk): add a channel-tiled accumulator variant (grid axis over C
    # marked "arbitrary" with pl.when init/finalize) for very large C where a
    # single (NB, C, min_tile, 128) block exceeds the VMEM budget.

    if HW % _LANE == 0:
        # ---- Fast path: free reshape to (N, C, S, 128). ------------------
        S = HW // _LANE
        row_bytes = bytes_per_elem * C * _LANE        # one S-row of a block
        max_ts = max(1, _TILE_BUDGET // row_bytes)
        if S <= max_ts:
            TS = S
        else:
            TS = max(sub, (max_ts // sub) * sub)
        num_s = pl.cdiv(S, TS)

        # Fold batch rows into one block when the whole spatial extent fits,
        # but keep >= 2 grid blocks so both v7x TensorCores stay busy.
        NB = 1
        if num_s == 1 and N > 1:
            max_nb = max(1, _TILE_BUDGET // (row_bytes * S))
            NB = _largest_divisor_leq(N, min(max_nb, max(1, N // 2)))
        elif num_s == 1 and N == 1 and S >= 2 * sub:
            TS = _round_up(pl.cdiv(S, 2), sub)
            num_s = pl.cdiv(S, TS)
        num_n = pl.cdiv(N, NB)

        x4 = x.reshape(N, C, S, _LANE)                          # free reshape
        gamma_b = jnp.broadcast_to(gamma_f32.reshape(1, C, 1, 1), (1, C, 1, _LANE))
        beta_b = jnp.broadcast_to(beta_f32.reshape(1, C, 1, 1), (1, C, 1, _LANE))

        block_bytes = bytes_per_elem * NB * C * TS * _LANE
        vmem_limit = int(min(vmem_ceiling, max(16 * _MIB, block_bytes + 8 * _MIB)))

        out = pl.pallas_call(
            kernel,
            out_shape=jax.ShapeDtypeStruct((N, C, S, _LANE), x.dtype),
            grid_spec=pltpu.PrefetchScalarGridSpec(
                num_scalar_prefetch=0,
                grid=(num_n, num_s),
                in_specs=[
                    pl.BlockSpec((NB, C, TS, _LANE), lambda n, s: (n, 0, s, 0)),
                    pl.BlockSpec((1, C, 1, _LANE), lambda n, s: (0, 0, 0, 0)),
                    pl.BlockSpec((1, C, 1, _LANE), lambda n, s: (0, 0, 0, 0)),
                ],
                out_specs=pl.BlockSpec((NB, C, TS, _LANE), lambda n, s: (n, 0, s, 0)),
            ),
            compiler_params=pltpu.CompilerParams(
                dimension_semantics=("parallel", "parallel"),
                vmem_limit_bytes=vmem_limit,
            ),
        )(x4, gamma_b, beta_b)
        return out.reshape(N, C, H, W)

    # ---- Ragged path (HW % 128 != 0): free reshape to (N, C, HW). --------
    # Tile the spatial dim with a 128-multiple tile (or the full extent) and
    # let Pallas mask the ragged last block.
    col_bytes = bytes_per_elem * C * _LANE
    max_t = max(_LANE, (max(1, _TILE_BUDGET // col_bytes)) * _LANE)
    if HW <= max_t:
        T = HW                 # full-extent block (allowed even if HW % 128 != 0)
    else:
        T = max_t              # multiple of 128; last block ragged (masked)
    num_t = pl.cdiv(HW, T)

    NB = 1
    if num_t == 1 and N > 1:
        max_nb = max(1, _TILE_BUDGET // (bytes_per_elem * C * T))
        NB = _largest_divisor_leq(N, min(max_nb, max(1, N // 2)))
    elif num_t == 1 and N == 1 and HW >= 16 * _LANE:
        T = _round_up(pl.cdiv(HW, 2), _LANE)
        num_t = pl.cdiv(HW, T)
    num_n = pl.cdiv(N, NB)

    x3 = x.reshape(N, C, HW)                                    # free reshape
    gamma_b = gamma_f32.reshape(1, C, 1)
    beta_b = beta_f32.reshape(1, C, 1)

    block_bytes = bytes_per_elem * NB * C * T
    vmem_limit = int(min(vmem_ceiling, max(16 * _MIB, block_bytes + 8 * _MIB)))

    out = pl.pallas_call(
        kernel,
        out_shape=jax.ShapeDtypeStruct((N, C, HW), x.dtype),
        grid_spec=pltpu.PrefetchScalarGridSpec(
            num_scalar_prefetch=0,
            grid=(num_n, num_t),
            in_specs=[
                pl.BlockSpec((NB, C, T), lambda n, t: (n, 0, t)),
                pl.BlockSpec((1, C, 1), lambda n, t: (0, 0, 0)),
                pl.BlockSpec((1, C, 1), lambda n, t: (0, 0, 0)),
            ],
            out_specs=pl.BlockSpec((NB, C, T), lambda n, t: (n, 0, t)),
        ),
        compiler_params=pltpu.CompilerParams(
            dimension_semantics=("parallel", "parallel"),
            vmem_limit_bytes=vmem_limit,
        ),
    )(x3, gamma_b, beta_b)
    return out.reshape(N, C, H, W)


def _reference(x, gamma, beta, eps=1e-5):
    # Plain-JAX reference mirroring the PyTorch forward exactly.
    mean = jnp.mean(x, axis=1, keepdims=True)                  # (N,1,H,W)
    var = jnp.var(x, axis=1, keepdims=True, ddof=1)            # unbiased
    inv_std = 1.0 / jnp.sqrt(var + eps)
    g = gamma.reshape(1, -1, 1, 1)
    b = beta.reshape(1, -1, 1, 1)
    return (x - mean) * inv_std * g + b


if __name__ == "__main__":
    key = jax.random.PRNGKey(0)

    # Main test: module-consistent small shape (HW % 128 == 0 fast path).
    N, C, H, W = 2, 4, 16, 16
    x = jax.random.normal(key, (N, C, H, W), dtype=jnp.float32)
    gamma = jnp.ones((C,), dtype=jnp.float32)   # nn.Parameter(torch.ones)
    beta = jnp.zeros((C,), dtype=jnp.float32)   # nn.Parameter(torch.zeros)

    out = batch_norm_2d(x, gamma, beta, eps=1e-5)
    out = jax.block_until_ready(out)
    ref = _reference(x, gamma, beta, eps=1e-5)
    assert out.shape == (N, C, H, W)
    assert jnp.allclose(out, ref, atol=1e-5, rtol=1e-5), "fast path mismatch"

    # Second test: ragged spatial extent (HW % 128 != 0) -> no-pad 3D path.
    H2, W2 = 5, 7
    x2 = jax.random.normal(jax.random.PRNGKey(1), (N, C, H2, W2), dtype=jnp.float32)
    out2 = batch_norm_2d(x2, gamma, beta, eps=1e-5)
    out2 = jax.block_until_ready(out2)
    ref2 = _reference(x2, gamma, beta, eps=1e-5)
    assert out2.shape == (N, C, H2, W2)
    assert jnp.allclose(out2, ref2, atol=1e-5, rtol=1e-5), "ragged path mismatch"

    print("KERNEL_OK")
</pallas_src>

<mosaic_0001>
module attributes {stable_mosaic.version = 11 : i64} {
  func.func @_bn2d_kernel(%arg0: i32, %arg1: i32, %arg2: memref<1x4x2x128xf32, #tpu.memory_space<vmem>>, %arg3: memref<1x4x1x128xf32, #tpu.memory_space<vmem>>, %arg4: memref<1x4x1x128xf32, #tpu.memory_space<vmem>>, %arg5: memref<1x4x2x128xf32, #tpu.memory_space<vmem>>) attributes {dimension_semantics = [#tpu.dimension_semantics<parallel>, #tpu.dimension_semantics<parallel>], iteration_bounds = array<i64: 2, 1>, scalar_prefetch = 0 : i64, scratch_operands = 0 : i64, tpu.core_type = #tpu.core_type<tc>, window_params = [{transform_indices = @transform_0, window_bounds = array<i64: 1, 4, 2, 128>}, {pipeline_mode = #tpu.pipeline_mode<synchronous>, transform_indices = @transform_1, window_bounds = array<i64: 1, 4, 1, 128>}, {pipeline_mode = #tpu.pipeline_mode<synchronous>, transform_indices = @transform_2, window_bounds = array<i64: 1, 4, 1, 128>}, {transform_indices = @transform_3, window_bounds = array<i64: 1, 4, 2, 128>}]} {
    %c0 = arith.constant 0 : index
    %c0_0 = arith.constant 0 : index
    %c0_1 = arith.constant 0 : index
    %c0_2 = arith.constant 0 : index
    %0 = vector.load %arg2[%c0, %c0_0, %c0_1, %c0_2] : memref<1x4x2x128xf32, #tpu.memory_space<vmem>>, vector<1x4x2x128xf32>
    %cst = arith.constant dense<0.000000e+00> : vector<1x2x128xf32>
    %1 = vector.multi_reduction <add>, %0, %cst [1] : vector<1x4x2x128xf32> to vector<1x2x128xf32>
    %2 = vector.shape_cast %1 : vector<1x2x128xf32> to vector<1x1x2x128xf32>
    %cst_3 = arith.constant 2.500000e-01 : f32
    %3 = vector.broadcast %cst_3 : f32 to vector<1x1x2x128xf32>
    %4 = arith.mulf %2, %3 : vector<1x1x2x128xf32>
    %5 = vector.broadcast %4 : vector<1x1x2x128xf32> to vector<1x4x2x128xf32>
    %6 = arith.subf %0, %5 : vector<1x4x2x128xf32>
    %7 = arith.mulf %6, %6 : vector<1x4x2x128xf32>
    %cst_4 = arith.constant dense<0.000000e+00> : vector<1x2x128xf32>
    %8 = vector.multi_reduction <add>, %7, %cst_4 [1] : vector<1x4x2x128xf32> to vector<1x2x128xf32>
    %9 = vector.shape_cast %8 : vector<1x2x128xf32> to vector<1x1x2x128xf32>
    %cst_5 = arith.constant 3.000000e+00 : f32
    %10 = vector.broadcast %cst_5 : f32 to vector<1x1x2x128xf32>
    %11 = arith.divf %9, %10 : vector<1x1x2x128xf32>
    %cst_6 = arith.constant 9.99999974E-6 : f32
    %12 = vector.broadcast %cst_6 : f32 to vector<1x1x2x128xf32>
    %13 = arith.addf %11, %12 : vector<1x1x2x128xf32>
    %14 = math.rsqrt %13 : vector<1x1x2x128xf32>
    %c0_7 = arith.constant 0 : index
    %c0_8 = arith.constant 0 : index
    %c0_9 = arith.constant 0 : index
    %c0_10 = arith.constant 0 : index
    %15 = vector.load %arg3[%c0_7, %c0_8, %c0_9, %c0_10] : memref<1x4x1x128xf32, #tpu.memory_space<vmem>>, vector<1x4x1x128xf32>
    %c0_11 = arith.constant 0 : index
    %c0_12 = arith.constant 0 : index
    %c0_13 = arith.constant 0 : index
    %c0_14 = arith.constant 0 : index
    %16 = vector.load %arg4[%c0_11, %c0_12, %c0_13, %c0_14] : memref<1x4x1x128xf32, #tpu.memory_space<vmem>>, vector<1x4x1x128xf32>
    %17 = vector.broadcast %14 : vector<1x1x2x128xf32> to vector<1x4x2x128xf32>
    %18 = arith.mulf %6, %17 : vector<1x4x2x128xf32>
    %19 = vector.broadcast %15 : vector<1x4x1x128xf32> to vector<1x4x2x128xf32>
    %20 = arith.mulf %18, %19 : vector<1x4x2x128xf32>
    %21 = vector.broadcast %16 : vector<1x4x1x128xf32> to vector<1x4x2x128xf32>
    %22 = arith.addf %20, %21 : vector<1x4x2x128xf32>
    %c0_15 = arith.constant 0 : index
    %c0_16 = arith.constant 0 : index
    %c0_17 = arith.constant 0 : index
    %c0_18 = arith.constant 0 : index
    %23 = vector.load %arg5[%c0_15, %c0_16, %c0_17, %c0_18] : memref<1x4x2x128xf32, #tpu.memory_space<vmem>>, vector<1x4x2x128xf32>
    tpu.vector_store %arg5[%c0_15, %c0_16, %c0_17, %c0_18], %22 {strides = array<i32>} : memref<1x4x2x128xf32, #tpu.memory_space<vmem>>, vector<1x4x2x128xf32>,
    return
  }
  func.func @transform_0(%arg0: i32, %arg1: i32) -> (i32, i32, i32, i32) {
    %c0_i32 = arith.constant 0 : i32
    %c0_i32_0 = arith.constant 0 : i32
    %c0_i32_1 = arith.constant 0 : i32
    return %arg0, %c0_i32, %arg1, %c0_i32_0 : i32, i32, i32, i32
  }
  func.func @transform_1(%arg0: i32, %arg1: i32) -> (i32, i32, i32, i32) {
    %c0_i32 = arith.constant 0 : i32
    %c0_i32_0 = arith.constant 0 : i32
    %c0_i32_1 = arith.constant 0 : i32
    %c0_i32_2 = arith.constant 0 : i32
    %c0_i32_3 = arith.constant 0 : i32
    return %c0_i32, %c0_i32_0, %c0_i32_1, %c0_i32_2 : i32, i32, i32, i32
  }
  func.func @transform_2(%arg0: i32, %arg1: i32) -> (i32, i32, i32, i32) {
    %c0_i32 = arith.constant 0 : i32
    %c0_i32_0 = arith.constant 0 : i32
    %c0_i32_1 = arith.constant 0 : i32
    %c0_i32_2 = arith.constant 0 : i32
    %c0_i32_3 = arith.constant 0 : i32
    return %c0_i32, %c0_i32_0, %c0_i32_1, %c0_i32_2 : i32, i32, i32, i32
  }
  func.func @transform_3(%arg0: i32, %arg1: i32) -> (i32, i32, i32, i32) {
    %c0_i32 = arith.constant 0 : i32
    %c0_i32_0 = arith.constant 0 : i32
    %c0_i32_1 = arith.constant 0 : i32
    return %arg0, %c0_i32, %arg1, %c0_i32_0 : i32, i32, i32, i32
  }
}

</mosaic_0001>

<bundles_post_ra>
// kernel: tpu_custom_call.1
= control target key start
LH: loop header
LB: loop body
LE: loop exit
PB: predicated region body
PF: predicated region fallthrough
CT: control target
= control target key end

     0   :  { %8 = vsyncpa [#allocation3], 0  ;;  %s961_s0 = inlined_call_operand.hbm [shape: f32[2,4,2,128], index: 0, kind: input, shape index: {}]   ;;  %s962_s1 = inlined_call_operand.hbm [shape: f32[1,4,1,128], index: 1, kind: input, shape index: {}]   ;;  %s963_s2 = inlined_call_operand.vmem [shape: f32[1,4,1,128], index: 2, kind: input, shape index: {}]   ;;  %s964_s3 = inlined_call_operand.hbm [shape: f32[2,4,2,128], index: 3, kind: output, shape index: {}]  }
   0x1   :  { %10 = vsyncpa [#allocation3 + $0x1], 0 }
   0x2   :  { %11 = vsyncpa [#allocation6], 0 }
   0x3   :  { %12 = vsyncpa [#allocation4], 0 }
   0x4   :  { %14 = vsyncpa [#allocation4 + $0x1], 0  ;;  %s718_s12 = smov 0   ;;  %s720_s13 = smov 0  }
   0x5   :  { %s722_s14 = smov 0   ;;  %s724_s15 = smov 0  }
   0x6   :  { %s726_s16 = smov 0   ;;  %s728_s17 = smov 0  }
   0x7 LB: > { %s435_s18 = sadd.s32 4294967295, %s687_s17   ;;  %s436_s19 = sadd.s32 4294967294, %s687_s17   ;;  %s687_s17 = sphi %s728_s17, %s20_s17   ;;  %s683_s16 = sphi %s726_s16, %s988_s16   ;;  %s679_s15 = sphi %s724_s15, %s987_s15   ;;  %s675_s14 = sphi %s722_s14, %s986_s14   ;;  %s671_s13 = sphi %s720_s13, %s985_s13   ;;  %s667_s12 = sphi %s718_s12, %s984_s12  }
   0x8   : > { %p54_p0 = scmp.ne.s32.totalorder %s671_s13, %s667_s12  ;;  %p752_p1 = scmp.eq.s32.totalorder %s435_s18, 0 }
   0x9   : > { %p756_p2 = scmp.eq.s32.totalorder %s435_s18, 1  ;;  %p128_p3 = scmp.eq.s32.totalorder %s436_s19, 1 }
   0xa   : > { %s969_s20 = scalar_select %p752_p1, 1, 0 }
   0xb   : > { %s970_s21 = scalar_select %p756_p2, 1, 0 }
   0xc   : > { %p762_p4 = por %p752_p1, %p54_p0  ;;  %p437_p5 = scmp.ge.s32.totalorder %s687_s17, 1 }
   0xd   : > { %p767_p6 = por %p128_p3, %p54_p0  ;;  %p135_p7 = scmp.lt.s32.totalorder %s687_s17, 3 }
   0xe   : > { %s971_s22 = scalar_select %p762_p4, 1, 0 }
   0xf   : > { %s972_s23 = scalar_select %p767_p6, 1, 0 }
  0x10   : > { %p772_p8 = pnand %p437_p5, %p135_p7  ;;  %s689_s25 = smov [#allocation5]  }
  0x11   : > { %s147_s26 = sshll.u32 %s689_s25, 4  ;;  %s32_s28 = sadd.s32 1, %s683_s16  ;;  %s148_s26 = int_to_ptr.vmem [resolvable:$true] %s147_s26 }
  0x12   : > { %s973_s24 = scalar_select %p772_p8, 1, 0 }
  0x13   : > { %p470_p9 = pneg %p772_p8  ;;  %s543_s4 = scalar_lea.hbm %s962_s1, 64 }
  0x14   : > { %p544_p12 = scmp.ne.s32.totalorder %s962_s1, %s543_s4  ;;  %p550_p5 = scmp.lt.u32.totalorder %s543_s4, %s962_s1 }
  0x15   : > { %p781_p11 = pnand %p470_p9, %p752_p1 }
  0x17   : > { %p545_p13 = pneg %p781_p11 }
  0x19   : > { %p546_p0 = pnand %p545_p13, %p544_p12 }
  0x1b   : > { %p547_p3 = pneg %p546_p0 }
  0x1d   : > { %p552_p7 = pnand %p550_p5, %p547_p3 }
  0x1f   : > { %555 = shalt.err (!%p552_p7)
}
  0x20   : > { %s556_s9 = scalar_lea.vmem %s148_s26, 64  ;;  %p564_p1 = scmp.lt.s32.totalorder %s148_s26, %s148_s26 }
  0x21   : > { %p557_p9 = scmp.ne.s32.totalorder %s148_s26, %s556_s9  ;;  %p565_p4 = scmp.lt.s32.totalorder %s556_s9, %s556_s9 }
  0x23   : > { %p559_p10 = pnand %p557_p9, %p545_p13  ;;  %p566_p8 = por %p565_p4, %p564_p1 }
  0x25   : > { %p560_p6 = pneg %p559_p10 }
  0x27   : > { %p567_p2 = pnand %p566_p8, %p560_p6 }
  0x29   : > { %570 = shalt.err (!%p567_p2)
}
  0x2a   : > { %s690_s10 = smov 16   ;;  %s691_s11 = smov 1  }
  0x2b   : > { %473 = dma.hbm_to_vmem [thread:$0]  (!%p781_p11), %s962_s1, 64, %s148_s26, [#allocation6], %s690_s10, %s690_s10, %s691_s11  }
  0x2c   : > { %p34_p1 = scmp.ge.s32.totalorder %s32_s28, 2  ;;  %s41_s25 = sadd.s32 1, %s675_s14 }
  0x2d   : > { %p48_p2 = scmp.ne.s32.totalorder %s675_s14, %s671_s13  ;;  %p49_p4 = scmp.eq.s32.totalorder %s687_s17, 0 }
  0x2e   : > { %s990_s28 = smov (%p34_p1, %s32_s28), 0  ;;  %p976_p8 = scmp.ne.s32.totalorder %s970_s21, 0 }
  0x2f   : > { %p808_p6 = por %p49_p4, %p48_p2  ;;  %s36_s27 = ssub.s32 %s683_s16, %s990_s28 }
  0x30   : > { %p814_p10 = por %p976_p8, %p48_p2  ;;  %p483_p12 = scmp.lt.s32.totalorder %s687_s17, 2 }
  0x31   : > { %p39_p11 = scmp.eq.s32.totalorder %s36_s27, 0  ;;  %s164_s26 = sand.u32 1, %s675_s14  }
  0x32   : > { %s440_s4 = sshll.u32 %s164_s26, 3  ;;  %s460_s6 = sshll.u32 %s683_s16, 7 }
  0x33   : > { %s823_s5 = scalar_select %p39_p11, %s675_s14, %s41_s25  }
  0x34   : > { %s829_s9 = scalar_lea.hbm %s961_s0, %s460_s6  ;;  %s168_s21 = scalar_lea.vmem [#allocation2], %s440_s4 }
  0x35   : > { %s176_s10 = sshll.u32 %s168_s21, 4  ;;  %p835_p13 = pnand %p483_p12, %p808_p6  ;;  %s831_s10 = int_to_ptr.vmem [resolvable:$true] %s176_s10 }
  0x36   : > { %s839_s18 = scalar_lea.sflag [#allocation3], %s164_s26  ;;  %s571_s19 = scalar_lea.hbm %s829_s9, 128 }
  0x37   : > { %p572_p0 = scmp.ne.s32.totalorder %s829_s9, %s571_s19  ;;  %p573_p3 = pneg %p835_p13 }
  0x38   : > { %s576_s29 = scalar_lea.hbm %s961_s0, 256  ;;  %p577_p9 = scmp.lt.u32.totalorder %s829_s9, %s961_s0 }
  0x39   : > { %p574_p5 = pnand %p573_p3, %p572_p0  ;;  %p578_p1 = scmp.lt.u32.totalorder %s576_s29, %s571_s19 }
  0x3a   : > { %p580_p4 = scmp.lt.u32.totalorder %s571_s19, %s829_s9 }
  0x3b   : > { %p575_p7 = pneg %p574_p5  ;;  %p579_p2 = por %p578_p1, %p577_p9 }
  0x3d   : > { %p581_p6 = por %p580_p4, %p579_p2 }
  0x3f   : > { %p582_p8 = pnand %p581_p6, %p575_p7 }
  0x41   : > { %585 = shalt.err (!%p582_p8)
}
  0x42   : > { %s586_s26 = scalar_lea.vmem %s831_s10, 128  ;;  %s692_s7 = smov [#allocation2]  }
  0x43   : > { %p587_p12 = scmp.ne.s32.totalorder %s831_s10, %s586_s26  ;;  %s591_s8 = sshll.u32 %s692_s7, 4  ;;  %s592_s8 = int_to_ptr.vmem [resolvable:$false] %s591_s8 }
  0x44   : > { %s593_s21 = scalar_lea.vmem %s592_s8, 256  ;;  %p594_p5 = scmp.lt.s32.totalorder %s831_s10, %s592_s8 }
  0x45   : > { %p589_p11 = pnand %p587_p12, %p573_p3  ;;  %p595_p9 = scmp.lt.s32.totalorder %s593_s21, %s586_s26 }
  0x47   : > { %p590_p0 = pneg %p589_p11  ;;  %p596_p1 = por %p595_p9, %p594_p5 }
  0x49   : > { %p597_p2 = pnand %p596_p1, %p590_p0 }
  0x4b   : > { %600 = shalt.err (!%p597_p2)
}
  0x4c   : > { %s693_s19 = smov 32   ;;  %s694_s25 = smov 2  }
  0x4d   : > { %477 = dma.hbm_to_vmem [thread:$0]  (!%p835_p13), %s829_s9, 128, %s831_s10, %s839_s18, %s693_s19, %s693_s19, %s694_s25  }
  0x4e   : > { %p979_p3 = scmp.ne.s32.totalorder %s973_s24, 0 }
  0x4f   : > { %s870_s27 = sand.u32 (!%p979_p3), 1, %s671_s13   ;;  %p980_p7 = scmp.ne.s32.totalorder (!%p979_p3), %s971_s22, 0 }
  0x50   : > { %188 = sbr.rel (%p979_p3) target bundleno = 150 (0x96), region = 32  ;;  %s444_s29 = sshll.u32 (!%p979_p3), %s870_s27, 3 }
  0x51   : > { %s191_s4 = scalar_lea.sflag (!%p979_p3), [#allocation3], %s870_s27  ;;  %s194_s6 = scalar_lea.vmem (!%p979_p3), [#allocation2], %s444_s29 }
  0x57   : > { %654 = dma.done.wait (%p980_p7), %s191_s4, 128  }
  0x58   : > { %656 = vsyncadd (%p980_p7), %s191_s4, 4294967168  ;;  %p981_p13 = scmp.ne.s32.totalorder %s969_s20, 0 }
  0x5a   : > { %658 = dma.done.wait (%p981_p13), [#allocation6], 64  }
  0x5b   : > { %660 = vsyncadd (%p981_p13), [#allocation6], 4294967232  ;;  %vm225_vm0 = vcmask 1041408   ;;  %v221_v0 = vld [vmem:[%s194_s6] sm:$0x3]  ;;  %s220_s24 = scalar_lea.vmem [#allocation7], %s444_s29 }
  0x5c   : > { %v222_v1 = vld [vmem:[%s194_s6 + $0x2] sm:$0x3]  ;;  %v223_v2 = vld [vmem:[%s194_s6 + $0x4] sm:$0x3]  ;;  %v224_v3 = vld [vmem:[%s194_s6 + $0x6] sm:$0x3] }
  0x5d   : > { %v226_v4 = vsel %vm225_vm0, %v221_v0, 0.0  ;;  %v227_v5 = vsel %vm225_vm0, %v222_v1, 0.0  ;;  %v229_v6 = vsel %vm225_vm0, %v223_v2, 0.0  ;;  %v231_v8 = vsel %vm225_vm0, %v224_v3, 0.0  ;;  %v447_v29 = vld [vmem:[#allocation5] ss:$0 sm:$0xff] }
  0x5e   : > { %v228_v7 = vadd.f32 %v227_v5, %v226_v4  ;;  %v448_v31 = vld [vmem:[#allocation5 + $0x1] ss:$0 sm:$0xff]  ;;  %v449_v32 = vld [vmem:[#allocation5 + $0x2] ss:$0 sm:$0xff]  ;;  %v450_v33 = vld [vmem:[#allocation5 + $0x3] ss:$0 sm:$0xff] }
  0x5f   : > { %v451_v34 = vld [vmem:[%s963_s2] ss:$0 sm:$0xff]  ;;  %s340_s9 = sshll.u32 %s220_s24, 4  ;;  %s461_s10 = sshll.u32 %s679_s15, 7  ;;  %v452_v39 = vld [vmem:[%s963_s2 + $0x1] ss:$0 sm:$0xff]  ;;  %s907_s9 = int_to_ptr.vmem [resolvable:$true] %s340_s9 }
  0x60   : > { %v230_v9 = vadd.f32 %v229_v6, %v228_v7  ;;  %v453_v40 = vld [vmem:[%s963_s2 + $0x2] ss:$0 sm:$0xff]  ;;  %v454_v41 = vld [vmem:[%s963_s2 + $0x3] ss:$0 sm:$0xff]  ;;  %s912_s25 = scalar_lea.hbm %s964_s3, %s461_s10  ;;  %s326_s29 = scalar_lea.sflag [#allocation4], %s870_s27 }
  0x61   : > { %s601_s4 = scalar_lea.vmem %s907_s9, 128  ;;  %s695_s6 = smov [#allocation7]  }
  0x62   : > { %v232_v10 = vadd.f32 %v231_v8, %v230_v9  ;;  %p602_p4 = scmp.ne.s32.totalorder %s907_s9, %s601_s4  ;;  %s605_s20 = sshll.u32 %s695_s6, 4  ;;  %s606_s20 = int_to_ptr.vmem [resolvable:$false] %s605_s20 }
  0x63   : > { %s607_s22 = scalar_lea.vmem %s606_s20, 256  ;;  %p608_p12 = scmp.lt.s32.totalorder %s907_s9, %s606_s20 }
  0x64   : > { %v233_v11 = vmul.f32 0.25, %v232_v10  ;;  %p603_p6 = pnand %p602_p4, %p814_p10  ;;  %p609_p11 = scmp.lt.s32.totalorder %s607_s22, %s601_s4 }
  0x66   : > { %v234_v12 = vsub.f32 %v221_v0, %v233_v11  ;;  %v235_v13 = vsub.f32 %v222_v1, %v233_v11  ;;  %v236_v14 = vsub.f32 %v223_v2, %v233_v11  ;;  %v237_v15 = vsub.f32 %v224_v3, %v233_v11  ;;  %p604_p8 = pneg %p603_p6  ;;  %p610_p0 = por %p609_p11, %p608_p12 }
  0x68   : > { %v238_v16 = vmul.f32 %v234_v12, %v234_v12  ;;  %v239_v17 = vmul.f32 %v235_v13, %v235_v13  ;;  %v240_v18 = vmul.f32 %v236_v14, %v236_v14  ;;  %v241_v19 = vmul.f32 %v237_v15, %v237_v15  ;;  %p611_p5 = pnand %p610_p0, %p604_p8 }
  0x6a   : > { %v242_v20 = vsel %vm225_vm0, %v238_v16, 0.0  ;;  %v243_v21 = vsel %vm225_vm0, %v239_v17, 0.0  ;;  %v245_v22 = vsel %vm225_vm0, %v240_v18, 0.0  ;;  %v247_v24 = vsel %vm225_vm0, %v241_v19, 0.0 }
  0x6b   : > { %v244_v23 = vadd.f32 %v243_v21, %v242_v20 }
  0x6d   : > { %v246_v25 = vadd.f32 %v245_v22, %v244_v23 }
  0x6f   : > { %v248_v26 = vadd.f32 %v247_v24, %v246_v25 }
  0x71   : > { %v250_v27 = vmul.f32 0.33333334, %v248_v26 }
  0x73   : > { %v251_v28 = vadd.f32 1e-05, %v250_v27 }
  0x75   : > { %541 = vrsqrt.f32 %v251_v28 }
  0x7f   : > { %v542_v30 = vpop.eup %541 }
  0x80   : > { %v261_v35 = vmul.f32 %v542_v30, %v234_v12  ;;  %v262_v36 = vmul.f32 %v542_v30, %v235_v13  ;;  %v263_v37 = vmul.f32 %v542_v30, %v236_v14  ;;  %v264_v38 = vmul.f32 %v542_v30, %v237_v15 }
  0x82   : > { %v289_v42 = vmul.f32 %v447_v29, %v261_v35  ;;  %v290_v43 = vmul.f32 %v448_v31, %v262_v36  ;;  %v291_v44 = vmul.f32 %v449_v32, %v263_v37  ;;  %v292_v45 = vmul.f32 %v450_v33, %v264_v38 }
  0x84   : > { %v317_v46 = vadd.f32 %v451_v34, %v289_v42  ;;  %v318_v47 = vadd.f32 %v452_v39, %v290_v43  ;;  %v319_v48 = vadd.f32 %v453_v40, %v291_v44  ;;  %v320_v49 = vadd.f32 %v454_v41, %v292_v45 }
  0x86   : > { %321 = vst [vmem:[%s220_s24] sm:$0x3] %v317_v46  ;;  %322 = vst [vmem:[%s220_s24 + $0x2] sm:$0x3] %v318_v47 }
  0x87   : > { %323 = vst [vmem:[%s220_s24 + $0x4] sm:$0x3] %v319_v48  ;;  %324 = vst [vmem:[%s220_s24 + $0x6] sm:$0x3] %v320_v49 }
  0x88   : > { %614 = shalt.err (!%p611_p5)
}
  0x89   : > { %s615_s24 = scalar_lea.hbm %s912_s25, 128  ;;  %s619_s18 = scalar_lea.hbm %s964_s3, 256 }
  0x8a   : > { %p616_p9 = scmp.ne.s32.totalorder %s912_s25, %s615_s24  ;;  %p620_p3 = scmp.lt.u32.totalorder %s912_s25, %s964_s3 }
  0x8b   : > { %p621_p7 = scmp.lt.u32.totalorder %s619_s18, %s615_s24  ;;  %p623_p4 = scmp.lt.u32.totalorder %s615_s24, %s912_s25 }
  0x8c   : > { %p617_p1 = pnand %p616_p9, %p814_p10 }
  0x8d   : > { %p622_p13 = por %p621_p7, %p620_p3 }
  0x8e   : > { %p618_p2 = pneg %p617_p1 }
  0x8f   : > { %p624_p6 = por %p623_p4, %p622_p13 }
  0x91   : > { %p625_p8 = pnand %p624_p6, %p618_p2 }
  0x93   : > { %628 = shalt.err (!%p625_p8)
}
  0x94   : > { %s696_s8 = smov 32   ;;  %s697_s21 = smov 2  }
  0x95   : > { %468 = dma.vmem_to_hbm [thread:$0]  (%p814_p10), %s907_s9, 128, %s912_s25, %s326_s29, %s696_s8, %s696_s8, %s697_s21  }
  0x96 PF: > { %s355_s15 = sand.u32 1, %s667_s12   ;;  %p982_p12 = scmp.ne.s32.totalorder %s972_s23, 0 }
  0x97   : > { %p983_p11 = scmp.ge.s32.totalorder %s687_s17, 2  ;;  %s356_s19 = scalar_lea.sflag [#allocation4], %s355_s15 }
  0x99   : > { %p479_p0 = pnand %p983_p11, %p982_p12 }
  0x9b   : > { %662 = dma.done.wait (!%p479_p0), %s356_s19, 128  }
  0x9c   : > { %664 = vsyncadd (!%p479_p0), %s356_s19, 4294967168  ;;  %s20_s17 = sadd.s32 1, %s687_s17   ;;  %s984_s12 = smov %s671_s13 }
  0x9d   : > { %p17_p5 = scmp.ge.s32.totalorder %s20_s17, 4   ;;  %s985_s13 = smov %s675_s14 }
  0x9e   : > { %s986_s14 = smov %s823_s5  ;;  %s987_s15 = smov %s683_s16 }
  0x9f   : > { %s988_s16 = smov %s990_s28  ;;  %19 = sbr.rel (!%p17_p5) target bundleno = 7 (0x7), region = 81 }
  0xa6   :  { %361 = vsyncpa [#allocation3], 1 }
  0xa7   :  { %363 = vsyncpa [#allocation3 + $0x1], 1 }
  0xa8   :  { %364 = vsyncpa [#allocation6], 1 }
  0xa9   :  { %365 = vsyncpa [#allocation4], 1 }
  0xaa   :  { %367 = vsyncpa [#allocation4 + $0x1], 1 }

</bundles_post_ra>
